<compile_context>
chip_gen: v7x
topology: tpu7x:2x2x1
jax: 0.10.0
libtpu: 0.0.40
codegen_flags: <defaults>
</compile_context>

<pallas_src>
import functools

import jax
import jax.numpy as jnp
from jax.experimental import pallas as pl
from jax.experimental.pallas import tpu as pltpu


def _round_up(x, m):
    return -(-x // m) * m


def _focal_loss_kernel(x_ref, t_ref, a_ref, out_ref, *, gamma, hw, tile_hw, tile_axis):
    x = x_ref[...].astype(jnp.float32)                          # (1, C, T) logits
    t = t_ref[...]                                              # (1, 1, T) int32 targets
    alpha = a_ref[...].astype(jnp.float32).reshape(1, -1, 1)    # (1, C, 1)

    # Numerically stable softmax pieces over the class (sublane) axis.
    m = jnp.max(x, axis=1, keepdims=True)                       # (1, 1, T)
    z = x - m
    ez = jnp.exp(z)                                             # dense EUP use over all C
    sum_ez = jnp.sum(ez, axis=1, keepdims=True)                 # (1, 1, T)

    # One-hot gather of target-class quantities over C (XLU reduce, no MXU).
    cls = jax.lax.broadcasted_iota(jnp.int32, z.shape, 1)
    onehot = cls == t                                           # (1, C, T)
    z_t = jnp.sum(jnp.where(onehot, z, 0.0), axis=1, keepdims=True)     # (1,1,T)
    ez_t = jnp.sum(jnp.where(onehot, ez, 0.0), axis=1, keepdims=True)   # (1,1,T)
    at = jnp.sum(jnp.where(onehot, alpha, 0.0), axis=1, keepdims=True)  # (1,1,T)

    lse = jnp.log(sum_ez)
    logpt = z_t - lse                                           # log p(target)
    pt = ez_t / sum_ez                                          # p(target), no sparse exp

    one_minus_pt = 1.0 - pt
    if float(gamma) == int(gamma) and gamma >= 0:
        # Integer gamma (incl. gamma=0 and the common gamma=2): pure VPU
        # multiplies, no exp/log, no log(0) edge case when pt == 1.
        w = jnp.ones_like(one_minus_pt)
        for _ in range(int(gamma)):
            w = w * one_minus_pt
    else:
        w = jnp.maximum(one_minus_pt, 0.0) ** jnp.float32(gamma)
    loss = -1.0 * w * (logpt * at)                              # (1, 1, T)

    # Mask lanes past the true H*W (garbage from the padded tail block).
    col = (pl.program_id(tile_axis) * tile_hw
           + jax.lax.broadcasted_iota(jnp.int32, loss.shape, 2))
    loss = jnp.where(col < hw, loss, 0.0)

    # Per-block partial sum -> one lane-dense (8,128) output cell this step owns.
    s = jnp.sum(loss)
    out_ref[...] = jnp.full(out_ref.shape, s, dtype=jnp.float32)


def focal_loss(logits_nchw, target_nhw, alpha=None, gamma=0.0, size_average=True,
               tile_hw=None, vmem_budget_bytes=20 * 1024 * 1024):
    """Pallas focal loss (forward), matching the PyTorch FocalLoss module.

    logits_nchw: (N, C, H, W) float logits (f32 or bf16)
    target_nhw:  (N, H, W) integer class indices in [0, C)
    alpha:       None | float a (-> [a, 1-a], requires C == 2) | list/array (C,)
    Returns a scalar float32 (mean over N*H*W if size_average else sum).
    """
    N, C, H, W = logits_nchw.shape
    HW = H * W
    # Free reshapes (contiguous) — no transpose; H*W stays on the lane axis.
    x3d = logits_nchw.reshape(N, C, HW)
    t3d = target_nhw.reshape(N, 1, HW).astype(jnp.int32)

    if alpha is None:
        alpha_arr = jnp.ones((C,), dtype=jnp.float32)
    elif isinstance(alpha, (float, int)) and not isinstance(alpha, bool):
        alpha_arr = jnp.asarray([alpha, 1.0 - alpha], dtype=jnp.float32)
    else:
        alpha_arr = jnp.asarray(alpha, dtype=jnp.float32)
    assert alpha_arr.shape == (C,), "alpha must have one weight per class"
    alpha2d = alpha_arr.reshape(C, 1)

    if not (float(gamma) == int(gamma) and gamma >= 0):
        assert gamma > 0, "non-integer gamma must be > 0 (pt can reach exactly 1)"

    # ---- VMEM footprint per lane column (sublane-padding aware) ----
    itemsize = jnp.dtype(logits_nchw.dtype).itemsize
    sub = 8 * max(1, 4 // itemsize)                       # 8 for f32, 16 for bf16
    logits_col = _round_up(C, sub) * itemsize             # one logits buffer
    target_col = 8 * 4                                    # int32 (1,1,T) pads to 8 sublanes
    temps_col = 3 * _round_up(C, 8) * 4 + 8 * 8 * 4       # f32 cast + exp + onehot + small temps
    col_bytes = 2 * (logits_col + target_col) + temps_col  # inputs double-buffered

    budget = vmem_budget_bytes
    try:
        budget = min(budget, pltpu.get_tpu_info().vmem_capacity_bytes // 4)
    except Exception:
        pass

    hw_padded = _round_up(max(HW, 1), 128)
    if tile_hw is None:
        cap_vmem = max(128, (budget // col_bytes) // 128 * 128)
        # Enough grid steps to feed v7x's two TCs / the DMA pipeline on large
        # inputs, while keeping each step's logits block reasonably large.
        want_tiles = max(1, -(-8 // N))
        cap_steps = max(8 * 1024, _round_up(-(-HW // want_tiles), 128))
        tile_hw = min(cap_vmem, cap_steps, hw_padded)
    else:
        assert tile_hw % 128 == 0, "explicit tile_hw must be a multiple of 128"
    n_tiles = pl.cdiv(HW, tile_hw)

    # Grid ordering: larger parallel axis first (better 2-TC split on v7x).
    if n_tiles >= N:
        grid = (n_tiles, N)
        tile_axis = 0
        x_map = lambda j, n: (n, 0, j)
        t_map = lambda j, n: (n, 0, j)
        a_map = lambda j, n: (0, 0)
        o_map = lambda j, n: (n, j, 0, 0)
    else:
        grid = (N, n_tiles)
        tile_axis = 1
        x_map = lambda n, j: (n, 0, j)
        t_map = lambda n, j: (n, 0, j)
        a_map = lambda n, j: (0, 0)
        o_map = lambda n, j: (n, j, 0, 0)

    kernel = functools.partial(_focal_loss_kernel, gamma=float(gamma),
                               hw=HW, tile_hw=tile_hw, tile_axis=tile_axis)

    # Derive the VMEM limit from the padded footprint (+~30% headroom),
    # capped at 48 MiB so it never approaches v7x's 64 MiB-per-TC physical VMEM.
    vmem_limit = int(min(48 * 1024 * 1024,
                         max(8 * 1024 * 1024,
                             col_bytes * tile_hw * 13 // 10 + (2 << 20))))

    cost = pl.CostEstimate(
        flops=int(N * HW * (6 * C + 12)),
        transcendentals=int(N * HW * (C + 1)),
        bytes_accessed=int(N * HW * (C * itemsize + 4)
                           + N * n_tiles * 8 * 128 * 4 + C * 4),
    )

    partials = pl.pallas_call(
        kernel,
        out_shape=jax.ShapeDtypeStruct((N, n_tiles, 8, 128), jnp.float32),
        grid_spec=pltpu.PrefetchScalarGridSpec(
            num_scalar_prefetch=0,
            grid=grid,
            in_specs=[
                pl.BlockSpec((1, C, tile_hw), x_map),     # logits
                pl.BlockSpec((1, 1, tile_hw), t_map),     # targets
                pl.BlockSpec((C, 1), a_map),              # alpha (whole array)
            ],
            out_specs=pl.BlockSpec((1, 1, 8, 128), o_map),
        ),
        compiler_params=pltpu.CompilerParams(
            dimension_semantics=("parallel", "parallel"),
            vmem_limit_bytes=vmem_limit,
        ),
        cost_estimate=cost,
    )(x3d, t3d, alpha2d)

    # Every element of a (8,128) cell holds that block's partial sum; read one.
    total = jnp.sum(partials[:, :, 0, 0])
    if size_average:
        return total / jnp.float32(N * HW)
    return total


def focal_loss_ref(logits_nchw, target_nhw, alpha, gamma=2.0, size_average=True):
    """Pure-JAX reference mirroring the PyTorch module."""
    N, C, H, W = logits_nchw.shape
    x = jnp.transpose(logits_nchw.reshape(N, C, H * W), (0, 2, 1)).reshape(-1, C)
    x = x.astype(jnp.float32)
    t = target_nhw.reshape(-1).astype(jnp.int32)
    logp = jax.nn.log_softmax(x, axis=1)
    logpt = jnp.take_along_axis(logp, t[:, None], axis=1)[:, 0]
    pt = jnp.exp(logpt)
    at = jnp.asarray(alpha, dtype=jnp.float32)[t]
    logpt = logpt * at
    loss = -1.0 * (1.0 - pt) ** gamma * logpt
    return loss.mean() if size_average else loss.sum()


if __name__ == "__main__":
    # Case 1: NCHW logits, list alpha, gamma=2, mean reduction.
    key = jax.random.PRNGKey(0)
    N, C, H, W = 2, 4, 16, 16
    kx, kt = jax.random.split(key)
    logits = jax.random.normal(kx, (N, C, H, W), dtype=jnp.float32)
    target = jax.random.randint(kt, (N, H, W), 0, C, dtype=jnp.int32)
    alpha = [0.25, 0.25, 0.25, 0.25]

    out = jax.block_until_ready(
        focal_loss(logits, target, alpha, gamma=2.0, size_average=True))
    ref = focal_loss_ref(logits, target, alpha, gamma=2.0, size_average=True)
    assert jnp.allclose(out, ref, rtol=1e-5, atol=1e-5), (out, ref)

    # Case 2: scalar alpha (-> [a, 1-a]), sum reduction, H*W not divisible by
    # the (forced small) lane tile -> exercises the masked padded-tail path
    # and the per-block partial-sum output with multiple tiles.
    N2, C2, H2, W2 = 2, 2, 16, 12   # HW = 192, tile 128 -> 2 tiles, tail of 64
    k1, k2 = jax.random.split(jax.random.PRNGKey(1))
    logits2 = jax.random.normal(k1, (N2, C2, H2, W2), dtype=jnp.float32)
    target2 = jax.random.randint(k2, (N2, H2, W2), 0, C2, dtype=jnp.int32)
    out2 = jax.block_until_ready(
        focal_loss(logits2, target2, alpha=0.25, gamma=2.0,
                   size_average=False, tile_hw=128))
    ref2 = focal_loss_ref(logits2, target2, [0.25, 0.75],
                          gamma=2.0, size_average=False)
    assert jnp.allclose(out2, ref2, rtol=1e-5, atol=1e-5), (out2, ref2)

    print("KERNEL_OK")
</pallas_src>

<mosaic_0001>
module attributes {stable_mosaic.version = 11 : i64} {
  func.func @_focal_loss_kernel(%arg0: i32, %arg1: i32, %arg2: memref<1x4x256xf32, #tpu.memory_space<vmem>>, %arg3: memref<1x1x256xi32, #tpu.memory_space<vmem>>, %arg4: memref<4x1xf32, #tpu.memory_space<vmem>>, %arg5: memref<1x1x8x128xf32, #tpu.memory_space<vmem>>) attributes {dimension_semantics = [#tpu.dimension_semantics<parallel>, #tpu.dimension_semantics<parallel>], iteration_bounds = array<i64: 2, 1>, scalar_prefetch = 0 : i64, scratch_operands = 0 : i64, tpu.core_type = #tpu.core_type<tc>, window_params = [{transform_indices = @transform_0, window_bounds = array<i64: 1, 4, 256>}, {transform_indices = @transform_1, window_bounds = array<i64: 1, 1, 256>}, {pipeline_mode = #tpu.pipeline_mode<synchronous>, transform_indices = @transform_2, window_bounds = array<i64: 4, 1>}, {transform_indices = @transform_3, window_bounds = array<i64: 1, 1, 8, 128>}]} {
    %c0 = arith.constant 0 : index
    %c0_0 = arith.constant 0 : index
    %c0_1 = arith.constant 0 : index
    %0 = vector.load %arg2[%c0, %c0_0, %c0_1] : memref<1x4x256xf32, #tpu.memory_space<vmem>>, vector<1x4x256xf32>
    %c0_2 = arith.constant 0 : index
    %c0_3 = arith.constant 0 : index
    %c0_4 = arith.constant 0 : index
    %1 = vector.load %arg3[%c0_2, %c0_3, %c0_4] : memref<1x1x256xi32, #tpu.memory_space<vmem>>, vector<1x1x256xi32>
    %c0_5 = arith.constant 0 : index
    %c0_6 = arith.constant 0 : index
    %2 = vector.load %arg4[%c0_5, %c0_6] : memref<4x1xf32, #tpu.memory_space<vmem>>, vector<4x1xf32>
    %3 = vector.shape_cast %2 : vector<4x1xf32> to vector<1x4x1xf32>
    %cst = arith.constant dense<0xFF800000> : vector<1x256xf32>
    %4 = vector.multi_reduction <maximumf>, %0, %cst [1] : vector<1x4x256xf32> to vector<1x256xf32>
    %5 = vector.shape_cast %4 : vector<1x256xf32> to vector<1x1x256xf32>
    %6 = vector.broadcast %5 : vector<1x1x256xf32> to vector<1x4x256xf32>
    %7 = arith.subf %0, %6 : vector<1x4x256xf32>
    %8 = math.exp %7 : vector<1x4x256xf32>
    %cst_7 = arith.constant dense<0.000000e+00> : vector<1x256xf32>
    %9 = vector.multi_reduction <add>, %8, %cst_7 [1] : vector<1x4x256xf32> to vector<1x256xf32>
    %10 = vector.shape_cast %9 : vector<1x256xf32> to vector<1x1x256xf32>
    %11 = tpu.iota {dimensions = array<i32: 1>} : vector<1x4x256xi32>
    %12 = vector.broadcast %1 : vector<1x1x256xi32> to vector<1x4x256xi32>
    %13 = arith.cmpi eq, %11, %12 : vector<1x4x256xi32>
    %cst_8 = arith.constant 0.000000e+00 : f32
    %14 = vector.broadcast %cst_8 : f32 to vector<1x4x256xf32>
    %15 = arith.select %13, %7, %14 : vector<1x4x256xi1>, vector<1x4x256xf32>
    %cst_9 = arith.constant dense<0.000000e+00> : vector<1x256xf32>
    %16 = vector.multi_reduction <add>, %15, %cst_9 [1] : vector<1x4x256xf32> to vector<1x256xf32>
    %17 = vector.shape_cast %16 : vector<1x256xf32> to vector<1x1x256xf32>
    %cst_10 = arith.constant 0.000000e+00 : f32
    %18 = vector.broadcast %cst_10 : f32 to vector<1x4x256xf32>
    %19 = arith.select %13, %8, %18 : vector<1x4x256xi1>, vector<1x4x256xf32>
    %cst_11 = arith.constant dense<0.000000e+00> : vector<1x256xf32>
    %20 = vector.multi_reduction <add>, %19, %cst_11 [1] : vector<1x4x256xf32> to vector<1x256xf32>
    %21 = vector.shape_cast %20 : vector<1x256xf32> to vector<1x1x256xf32>
    %cst_12 = arith.constant 0.000000e+00 : f32
    %22 = vector.shape_cast %3 : vector<1x4x1xf32> to vector<1x4x1xf32>
    %23 = vector.broadcast %22 : vector<1x4x1xf32> to vector<1x4x256xf32>
    %24 = vector.broadcast %cst_12 : f32 to vector<1x4x256xf32>
    %25 = arith.select %13, %23, %24 : vector<1x4x256xi1>, vector<1x4x256xf32>
    %cst_13 = arith.constant dense<0.000000e+00> : vector<1x256xf32>
    %26 = vector.multi_reduction <add>, %25, %cst_13 [1] : vector<1x4x256xf32> to vector<1x256xf32>
    %27 = vector.shape_cast %26 : vector<1x256xf32> to vector<1x1x256xf32>
    %28 = math.log %10 : vector<1x1x256xf32>
    %29 = arith.subf %17, %28 : vector<1x1x256xf32>
    %30 = arith.divf %21, %10 : vector<1x1x256xf32>
    %cst_14 = arith.constant 1.000000e+00 : f32
    %31 = vector.broadcast %cst_14 : f32 to vector<1x1x256xf32>
    %32 = arith.subf %31, %30 : vector<1x1x256xf32>
    %cst_15 = arith.constant 1.000000e+00 : f32
    %33 = vector.broadcast %cst_15 : f32 to vector<1x1x256xf32>
    %34 = arith.mulf %33, %32 : vector<1x1x256xf32>
    %35 = arith.mulf %34, %32 : vector<1x1x256xf32>
    %cst_16 = arith.constant -1.000000e+00 : f32
    %36 = vector.broadcast %cst_16 : f32 to vector<1x1x256xf32>
    %37 = arith.mulf %36, %35 : vector<1x1x256xf32>
    %38 = arith.mulf %29, %27 : vector<1x1x256xf32>
    %39 = arith.mulf %37, %38 : vector<1x1x256xf32>
    %c256_i32 = arith.constant 256 : i32
    %40 = arith.muli %arg1, %c256_i32 : i32
    %41 = tpu.iota {dimensions = array<i32: 2>} : vector<1x1x256xi32>
    %42 = vector.broadcast %40 : i32 to vector<1x1x256xi32>
    %43 = arith.addi %42, %41 : vector<1x1x256xi32>
    %c256_i32_17 = arith.constant 256 : i32
    %44 = vector.broadcast %c256_i32_17 : i32 to vector<1x1x256xi32>
    %45 = arith.cmpi slt, %43, %44 : vector<1x1x256xi32>
    %cst_18 = arith.constant 0.000000e+00 : f32
    %46 = vector.broadcast %cst_18 : f32 to vector<1x1x256xf32>
    %47 = arith.select %45, %39, %46 : vector<1x1x256xi1>, vector<1x1x256xf32>
    %48 = vector.shape_cast %47 : vector<1x1x256xf32> to vector<1x1x1x256xf32>
    %cst_19 = arith.constant dense<0.000000e+00> : vector<1xf32>
    %49 = vector.multi_reduction <add>, %48, %cst_19 [1, 2, 3] : vector<1x1x1x256xf32> to vector<1xf32>
    %50 = vector.shape_cast %49 : vector<1xf32> to vector<1x1x1x1xf32>
    %51 = vector.extract %50[0, 0, 0, 0] : f32 from vector<1x1x1x1xf32>
    %52 = vector.broadcast %51 : f32 to vector<1x1x8x128xf32>
    %c0_20 = arith.constant 0 : index
    %c0_21 = arith.constant 0 : index
    %c0_22 = arith.constant 0 : index
    %c0_23 = arith.constant 0 : index
    %53 = vector.load %arg5[%c0_20, %c0_21, %c0_22, %c0_23] : memref<1x1x8x128xf32, #tpu.memory_space<vmem>>, vector<1x1x8x128xf32>
    tpu.vector_store %arg5[%c0_20, %c0_21, %c0_22, %c0_23], %52 {strides = array<i32>} : memref<1x1x8x128xf32, #tpu.memory_space<vmem>>, vector<1x1x8x128xf32>,
    return
  }
  func.func @transform_0(%arg0: i32, %arg1: i32) -> (i32, i32, i32) {
    %c0_i32 = arith.constant 0 : i32
    %c0_i32_0 = arith.constant 0 : i32
    return %arg0, %c0_i32, %arg1 : i32, i32, i32
  }
  func.func @transform_1(%arg0: i32, %arg1: i32) -> (i32, i32, i32) {
    %c0_i32 = arith.constant 0 : i32
    %c0_i32_0 = arith.constant 0 : i32
    return %arg0, %c0_i32, %arg1 : i32, i32, i32
  }
  func.func @transform_2(%arg0: i32, %arg1: i32) -> (i32, i32) {
    %c0_i32 = arith.constant 0 : i32
    %c0_i32_0 = arith.constant 0 : i32
    %c0_i32_1 = arith.constant 0 : i32
    return %c0_i32, %c0_i32_0 : i32, i32
  }
  func.func @transform_3(%arg0: i32, %arg1: i32) -> (i32, i32, i32, i32) {
    %c0_i32 = arith.constant 0 : i32
    %c0_i32_0 = arith.constant 0 : i32
    %c0_i32_1 = arith.constant 0 : i32
    return %arg0, %arg1, %c0_i32, %c0_i32_0 : i32, i32, i32, i32
  }
}

</mosaic_0001>

<bundles_post_ra>
// kernel: tpu_custom_call.1
= control target key start
LH: loop header
LB: loop body
LE: loop exit
PB: predicated region body
PF: predicated region fallthrough
CT: control target
= control target key end

     0   :  { %8 = vsyncpa [#allocation3], 0  ;;  %s940_s0 = inlined_call_operand.hbm [shape: f32[2,4,256], index: 0, kind: input, shape index: {}]   ;;  %s941_s1 = inlined_call_operand.vmem [shape: s32[2,1,256], index: 1, kind: input, shape index: {}]   ;;  %s942_s2 = inlined_call_operand.vmem [shape: f32[4,1], index: 2, kind: input, shape index: {}]   ;;  %s943_s3 = inlined_call_operand.hbm [shape: f32[2,1,8,128], index: 3, kind: output, shape index: {}]  }
   0x1   :  { %10 = vsyncpa [#allocation3 + $0x1], 0 }
   0x2   :  { %11 = vsyncpa [#allocation4], 0 }
   0x3   :  { %13 = vsyncpa [#allocation4 + $0x1], 0  ;;  %s740_s12 = smov 0   ;;  %s742_s13 = smov 0  }
   0x4   :  { %s744_s14 = smov 0   ;;  %s746_s15 = smov 0  }
   0x5   :  { %s748_s16 = smov 0   ;;  %s750_s17 = smov 0  }
   0x6 LB: > { %s510_s18 = sadd.s32 4294967295, %s715_s17   ;;  %s511_s19 = sadd.s32 4294967294, %s715_s17   ;;  %s715_s17 = sphi %s750_s17, %s19_s17   ;;  %s711_s16 = sphi %s748_s16, %s959_s16   ;;  %s707_s15 = sphi %s746_s15, %s958_s15   ;;  %s703_s14 = sphi %s744_s14, %s957_s14   ;;  %s699_s13 = sphi %s742_s13, %s956_s13   ;;  %s695_s12 = sphi %s740_s12, %s955_s12  }
   0x7   : > { %s31_s20 = sadd.s32 1, %s711_s16  ;;  %s40_s21 = sadd.s32 1, %s703_s14 }
   0x8   : > { %p33_p0 = scmp.ge.s32.totalorder %s31_s20, 2  ;;  %p47_p1 = scmp.ne.s32.totalorder %s703_s14, %s699_s13 }
   0x9   : > { %p48_p2 = scmp.eq.s32.totalorder %s715_s17, 0  ;;  %p53_p3 = scmp.ne.s32.totalorder %s699_s13, %s695_s12 }
   0xa   : > { %s961_s20 = smov (%p33_p0, %s31_s20), 0  ;;  %p54_p5 = scmp.eq.s32.totalorder %s510_s18, 0 }
   0xb   : > { %p781_p4 = por %p48_p2, %p47_p1  ;;  %s35_s23 = ssub.s32 %s711_s16, %s961_s20 }
   0xc   : > { %p128_p6 = scmp.eq.s32.totalorder %s510_s18, 1  ;;  %p38_p7 = scmp.eq.s32.totalorder %s35_s23, 0 }
   0xd   : > { %p787_p8 = por %p54_p5, %p53_p3  ;;  %p134_p10 = scmp.eq.s32.totalorder %s511_s19, 1 }
   0xe   : > { %p791_p9 = por %p128_p6, %p47_p1  ;;  %p540_p13 = scmp.lt.s32.totalorder %s715_s17, 2 }
   0xf   : > { %s796_s26 = scalar_select %p38_p7, %s703_s14, %s40_s21  }
  0x10   : > { %s947_s25 = scalar_select %p791_p9, 1, 0 }
  0x11   : > { %p798_p11 = por %p134_p10, %p53_p3  ;;  %s157_s28 = sand.u32 1, %s703_s14  }
  0x12   : > { %s514_s29 = sshll.u32 %s157_s28, 3  ;;  %s525_s30 = sshll.u32 %s711_s16, 7 }
  0x13   : > { %s948_s27 = scalar_select %p798_p11, 1, 0 }
  0x14   : > { %s809_s6 = scalar_lea.hbm %s940_s0, %s525_s30  ;;  %s161_s7 = scalar_lea.vmem [#allocation2], %s514_s29 }
  0x15   : > { %s171_s8 = sshll.u32 %s161_s7, 4  ;;  %p815_p0 = pnand %p540_p13, %p781_p4  ;;  %s811_s8 = int_to_ptr.vmem [resolvable:$true] %s171_s8 }
  0x16   : > { %s158_s10 = scalar_lea.sflag [#allocation3], %s157_s28  ;;  %s603_s11 = scalar_lea.hbm %s809_s6, 128 }
  0x17   : > { %p604_p3 = scmp.ne.s32.totalorder %s809_s6, %s603_s11  ;;  %p605_p5 = pneg %p815_p0 }
  0x18   : > { %s608_s21 = scalar_lea.hbm %s940_s0, 256  ;;  %p609_p4 = scmp.lt.u32.totalorder %s809_s6, %s940_s0 }
  0x19   : > { %p606_p6 = pnand %p605_p5, %p604_p3  ;;  %p610_p10 = scmp.lt.u32.totalorder %s608_s21, %s603_s11 }
  0x1a   : > { %p612_p12 = scmp.lt.u32.totalorder %s603_s11, %s809_s6 }
  0x1b   : > { %p607_p7 = pneg %p606_p6  ;;  %p611_p13 = por %p610_p10, %p609_p4 }
  0x1d   : > { %p613_p1 = por %p612_p12, %p611_p13 }
  0x1f   : > { %p614_p2 = pnand %p613_p1, %p607_p7 }
  0x21   : > { %617 = shalt.err (!%p614_p2)
}
  0x22   : > { %s618_s28 = scalar_lea.vmem %s811_s8, 128  ;;  %s717_s29 = smov [#allocation2]  }
  0x23   : > { %p619_p3 = scmp.ne.s32.totalorder %s811_s8, %s618_s28  ;;  %s623_s30 = sshll.u32 %s717_s29, 4  ;;  %s624_s30 = int_to_ptr.vmem [resolvable:$false] %s623_s30 }
  0x24   : > { %s625_s4 = scalar_lea.vmem %s624_s30, 256  ;;  %p626_p9 = scmp.lt.s32.totalorder %s811_s8, %s624_s30 }
  0x25   : > { %p621_p6 = pnand %p619_p3, %p605_p5  ;;  %p627_p4 = scmp.lt.s32.totalorder %s625_s4, %s618_s28 }
  0x27   : > { %p622_p11 = pneg %p621_p6  ;;  %p628_p10 = por %p627_p4, %p626_p9 }
  0x29   : > { %p629_p12 = pnand %p628_p10, %p622_p11 }
  0x2b   : > { %632 = shalt.err (!%p629_p12)
}
  0x2c   : > { %535 = dma.hbm_to_vmem [thread:$0]  (!%p815_p0), %s809_s6, 128, %s811_s8, %s158_s10  }
  0x2d   : > { %p950_p1 = scmp.lt.s32.totalorder %s715_s17, 3  ;;  %p951_p2 = scmp.ge.s32.totalorder %s715_s17, 1 }
  0x2f   : > { %p189_p5 = pnand %p951_p2, %p950_p1 }
  0x30   : > { %s851_s5 = sand.u32 (!%p189_p5), 1, %s699_s13  }
  0x31   : > { %192 = sbr.rel (%p189_p5) target bundleno = 427 (0x1ab), region = 32  ;;  %s518_s7 = sshll.u32 (!%p189_p5), %s851_s5, 3 }
  0x32   : > { %s195_s11 = scalar_lea.sflag (!%p189_p5), [#allocation3], %s851_s5  ;;  %s198_s9 = scalar_lea.vmem (!%p189_p5), [#allocation2], %s518_s7 }
  0x38   : > { %686 = dma.done.wait (%p787_p8), %s195_s11, 128  }
  0x39   : > { %688 = vsyncadd (%p787_p8), %s195_s11, 4294967168  ;;  %v718_v0 = vmov 0   ;;  %v241_v1 = vld [vmem:[%s942_s2] sm:$0xf]  ;;  %vm245_vm0 = vcmask 1043456   ;;  %p231_p8 = scmp.lt.s32.totalorder %s707_s15, 1  ;;  %v284_v21 = vlaneseq }
  0x3a   : > { %591 = vset.pattern.permute.xlu0 %v718_v0  ;;  %v239_v2 = vld [vmem:[%s198_s9] sm:$0xff]  ;;  %vm383_vm3 = vcmask 1040384   ;;  %s228_s22 = scalar_lea.vmem [#allocation5], %s518_s7  ;;  %s522_s28 = sshll.u32 %s707_s15, 7 }
  0x3b   : > { %333 = vperm.xlu0 %591, %v241_v1   ;;  %v243_v3 = vcombine.high %v239_v2, %v239_v2  ;;  %v246_v4 = vsel %vm245_vm0, %v239_v2, -inf  ;;  %s232_s24 = scalar_select %p231_p8, %s707_s15, 1  ;;  %v285_v23 = vshrl.u32 %v284_v21, 7 }
  0x3c   : > { %v247_v6 = vrot.slane %v246_v4, 4  ;;  %s413_s23 = sshll.u32 %s228_s22, 4  ;;  %s893_s11 = scalar_lea.hbm %s943_s3, %s522_s28  ;;  %s888_s23 = int_to_ptr.vmem [resolvable:$true] %s413_s23 }
  0x3d   : > { %v253_v5 = vsel %vm245_vm0, %v243_v3, -inf  ;;  %s520_s10 = sshll.u32 %s232_s24, 1  ;;  %v288_v25 = vsub.s32 0, %v285_v23  ;;  %v292_v26 = vsub.s32 1, %v285_v23  ;;  %s399_s9 = scalar_lea.sflag [#allocation4], %s851_s5 }
  0x3e   : > { %v254_v7 = vrot.slane %v253_v5, 4  ;;  %v248_v8 = vmax.f32 %v246_v4, %v247_v6  ;;  %s237_s21 = scalar_lea.vmem %s941_s1, %s520_s10  ;;  %s633_s6 = scalar_lea.vmem %s888_s23, 128 }
  0x3f   : > { %v240_v28 = vld [vmem:[%s237_s21] sm:$0x3]  ;;  %p634_p9 = scmp.ne.s32.totalorder %s888_s23, %s633_s6  ;;  %p952_p11 = scmp.ne.s32.totalorder %s947_s25, 0 }
  0x40   : > { %v255_v9 = vmax.f32 %v253_v5, %v254_v7  ;;  %v249_v10 = vrot.slane %v248_v8, 2  ;;  %v289_v32 = vrot.slane %v240_v28, %v288_v25  ;;  %v293_v33 = vrot.slane %v240_v28, %v292_v26  ;;  %s719_s15 = smov [#allocation5]  }
  0x41   : > { %p635_p0 = pnand %p634_p9, %p952_p11  ;;  %s637_s7 = sshll.u32 %s719_s15, 4  ;;  %s638_s7 = int_to_ptr.vmem [resolvable:$false] %s637_s7 }
  0x42   : > { %v256_v11 = vrot.slane %v255_v9, 2  ;;  %v250_v12 = vmax.f32 %v248_v8, %v249_v10  ;;  %vm294_vm1 = vcmp.eq.s32.totalorder %v285_v23, %v289_v32  ;;  %vm295_vm2 = vcmp.eq.s32.totalorder %v285_v23, %v293_v33  ;;  %s639_s8 = scalar_lea.vmem %s638_s7, 256  ;;  %p640_p13 = scmp.lt.s32.totalorder %s888_s23, %s638_s7 }
  0x43   : > { %p636_p7 = pneg %p635_p0  ;;  %p641_p3 = scmp.lt.s32.totalorder %s639_s8, %s633_s6 }
  0x44   : > { %v257_v13 = vmax.f32 %v255_v9, %v256_v11  ;;  %v251_v14 = vrot.slane %v250_v12, 1 }
  0x45   : > { %p642_p6 = por %p641_p3, %p640_p13 }
  0x46   : > { %v258_v15 = vrot.slane %v257_v13, 1  ;;  %v252_v16 = vmax.f32 %v250_v12, %v251_v14 }
  0x47   : > { %p643_p4 = pnand %p642_p6, %p636_p7 }
  0x48   : > { %v259_v17 = vmax.f32 %v257_v13, %v258_v15 }
  0x4a   : > { %v262_v18 = vcombine.low %v252_v16, %v259_v17 }
  0x4c   : > { %v264_v19 = vsub.f32 %v239_v2, %v262_v18 }
  0x4e   : > { %v265_v20 = vmul.f32 1.442695, %v264_v19  ;;  %v297_v44 = vcombine.high %v264_v19, %v264_v19  ;;  %v299_v49 = vsel %vm294_vm1, %v264_v19, 0.0 }
  0x4f   : > { %v301_v53 = vsel %vm245_vm0, %v299_v49, 0.0 }
  0x50   : > { %593 = vpow2.f32 %v265_v20  ;;  %v300_v50 = vsel %vm295_vm2, %v297_v44, 0.0  ;;  %v302_v59 = vrot.slane %v301_v53, 4 }
  0x51   : > { %v308_v54 = vsel %vm245_vm0, %v300_v50, 0.0 }
  0x52   : > { %v309_v60 = vrot.slane %v308_v54, 4  ;;  %v303_v63 = vadd.f32 %v302_v59, %v301_v53 }
  0x54   : > { %v310_v0 = vadd.f32 %v309_v60, %v308_v54  ;;  %v304_v3 = vrot.slane %v303_v63, 2 }
  0x56   : > { %v311_v4 = vrot.slane %v310_v0, 2  ;;  %v305_v9 = vadd.f32 %v304_v3, %v303_v63 }
  0x58   : > { %v312_v10 = vadd.f32 %v311_v4, %v310_v0  ;;  %v306_v16 = vrot.slane %v305_v9, 1 }
  0x5a   : > { %v594_v22 = vpop.eup %593  ;;  %v313_v17 = vrot.slane %v312_v10, 1 }
  0x5b   : > { %v268_v24 = vcombine.high %v594_v22, %v594_v22  ;;  %v270_v27 = vsel %vm245_vm0, %v594_v22, 0.0  ;;  %v315_v36 = vsel %vm294_vm1, %v594_v22, 0.0 }
  0x5c   : > { %v271_v30 = vrot.slane %v270_v27, 4  ;;  %v317_v40 = vsel %vm245_vm0, %v315_v36, 0.0 }
  0x5d   : > { %v277_v29 = vsel %vm245_vm0, %v268_v24, 0.0  ;;  %v316_v37 = vsel %vm295_vm2, %v268_v24, 0.0  ;;  %v318_v45 = vrot.slane %v317_v40, 4 }
  0x5e   : > { %v278_v31 = vrot.slane %v277_v29, 4  ;;  %v272_v34 = vadd.f32 %v271_v30, %v270_v27  ;;  %v324_v41 = vsel %vm245_vm0, %v316_v37, 0.0  ;;  %v314_v30 = vadd.f32 %v313_v17, %v312_v10 }
  0x5f   : > { %v325_v46 = vrot.slane %v324_v41, 4  ;;  %v319_v51 = vadd.f32 %v318_v45, %v317_v40 }
  0x60   : > { %v279_v35 = vadd.f32 %v278_v31, %v277_v29  ;;  %v273_v38 = vrot.slane %v272_v34, 2  ;;  %v307_v29 = vadd.f32 %v306_v16, %v305_v9 }
  0x61   : > { %v326_v52 = vadd.f32 %v325_v46, %v324_v41  ;;  %v320_v57 = vrot.slane %v319_v51, 2 }
  0x62   : > { %v280_v39 = vrot.slane %v279_v35, 2  ;;  %v274_v42 = vadd.f32 %v273_v38, %v272_v34 }
  0x63   : > { %v327_v58 = vrot.slane %v326_v52, 2  ;;  %v321_v61 = vadd.f32 %v320_v57, %v319_v51 }
  0x64   : > { %v281_v43 = vadd.f32 %v280_v39, %v279_v35  ;;  %v275_v47 = vrot.slane %v274_v42, 1 }
  0x65   : > { %v328_v62 = vadd.f32 %v327_v58, %v326_v52  ;;  %v322_v1 = vrot.slane %v321_v61, 1 }
  0x66   : > { %v282_v48 = vrot.slane %v281_v43, 1  ;;  %v276_v55 = vadd.f32 %v275_v47, %v274_v42 }
  0x67   : > { %v329_v2 = vrot.slane %v328_v62, 1  ;;  %v323_v6 = vadd.f32 %v322_v1, %v321_v61 }
  0x68   : > { %v283_v56 = vadd.f32 %v282_v48, %v281_v43  ;;  %595 = vrcp.f32 %v276_v55 }
  0x69   : > { %v330_v7 = vadd.f32 %v329_v2, %v328_v62 }
  0x6a   : > { %597 = vrcp.f32 %v283_v56 }
  0x6b   : > { %599 = vlog2.f32 %v276_v55 }
  0x6c   : > { %601 = vlog2.f32 %v283_v56 }
  0x72   : > { %v596_v5 = vpop.eup %595 }
  0x73   : > { %v359_v14 = vmul.f32 %v596_v5, %v323_v6 }
  0x74   : > { %v598_v8 = vpop.eup %597 }
  0x75   : > { %v361_v15 = vmul.f32 %v598_v8, %v330_v7  ;;  %v600_v20 = vpop.eup %599  ;;  %v362_v27 = vsub.f32 1.0, %v359_v14 }
  0x76   : > { %v602_v24 = vpop.eup %601  ;;  %v353_v32 = vmul.f32 0.6931472, %v600_v20 }
  0x77   : > { %v363_v28 = vsub.f32 1.0, %v361_v15  ;;  %v355_v33 = vmul.f32 0.6931472, %v602_v24  ;;  %v364_v36 = vmul.f32 %v362_v27, %v362_v27 }
  0x78   : > { %v356_v40 = vsub.f32 %v307_v29, %v353_v32 }
  0x79   : > { %v365_v37 = vmul.f32 %v363_v28, %v363_v28  ;;  %v357_v41 = vsub.f32 %v314_v30, %v355_v33  ;;  %v366_v44 = vmul.f32 -1.0, %v364_v36 }
  0x7b   : > { %v367_v45 = vmul.f32 -1.0, %v365_v37 }
  0xba   : > { %v334_v11 = vpop.permute.xlu0 %333 }
  0xbb   : > { %v336_v12 = vsel %vm294_vm1, %v334_v11, 0.0  ;;  %v337_v13 = vsel %vm295_vm2, %v334_v11, 0.0 }
  0xbc   : > { %v338_v18 = vsel %vm245_vm0, %v336_v12, 0.0  ;;  %v345_v19 = vsel %vm245_vm0, %v337_v13, 0.0 }
  0xbd   : > { %v339_v21 = vrot.slane %v338_v18, 4  ;;  %v346_v22 = vrot.slane %v345_v19, 4 }
  0xbf   : > { %v340_v25 = vadd.f32 %v339_v21, %v338_v18  ;;  %v347_v26 = vadd.f32 %v346_v22, %v345_v19 }
  0xc1   : > { %v341_v23 = vrot.slane %v340_v25, 2  ;;  %v348_v31 = vrot.slane %v347_v26, 2 }
  0xc3   : > { %v342_v34 = vadd.f32 %v341_v23, %v340_v25  ;;  %v349_v35 = vadd.f32 %v348_v31, %v347_v26 }
  0xc5   : > { %v343_v38 = vrot.slane %v342_v34, 1  ;;  %v350_v39 = vrot.slane %v349_v35, 1 }
  0xc7   : > { %v344_v42 = vadd.f32 %v343_v38, %v342_v34  ;;  %v351_v43 = vadd.f32 %v350_v39, %v349_v35 }
  0xc9   : > { %v368_v46 = vmul.f32 %v356_v40, %v344_v42  ;;  %v369_v47 = vmul.f32 %v357_v41, %v351_v43 }
  0xcb   : > { %v370_v48 = vmul.f32 %v368_v46, %v366_v44  ;;  %v371_v49 = vmul.f32 %v369_v47, %v367_v45 }
  0xcd   : > { %v384_v50 = vsel %vm383_vm3, %v370_v48, 0.0  ;;  %v385_v51 = vsel %vm383_vm3, %v371_v49, 0.0 }
  0xce   : > { %v386_v52 = vadd.f32 %v385_v51, %v384_v50 }
  0xd0   : > { %387 = vadd.xlane.f32.xlu0 %v386_v52 }
 0x15d   : > { %v388_v53 = vpop.xlane.xlu0 %387 }
 0x15e   : > { %v389_v54 = vrot.slane %v388_v53, 4 }
 0x160   : > { %v390_v55 = vadd.f32 %v389_v54, %v388_v53 }
 0x162   : > { %v391_v56 = vrot.slane %v390_v55, 2 }
 0x164   : > { %v392_v57 = vadd.f32 %v391_v56, %v390_v55 }
 0x166   : > { %v393_v58 = vrot.slane %v392_v57, 1 }
 0x168   : > { %v394_v59 = vadd.f32 %v393_v58, %v392_v57 }
 0x16a   : > { %526 = vpush %v394_v59 }
 0x19b   : > { %s527_s29 = spop %526 }
 0x19c   : > { %v396_v60 = vstv %s527_s29 }
 0x19d   : > { %397 = vst [vmem:[%s228_s22] sm:$0xff] %v396_v60 }
 0x19e   : > { %646 = shalt.err (!%p643_p4)
}
 0x19f   : > { %s647_s5 = scalar_lea.hbm %s893_s11, 128  ;;  %s651_s18 = scalar_lea.hbm %s943_s3, 256 }
 0x1a0   : > { %p648_p10 = scmp.ne.s32.totalorder %s893_s11, %s647_s5  ;;  %p652_p2 = scmp.lt.u32.totalorder %s893_s11, %s943_s3 }
 0x1a1   : > { %p653_p5 = scmp.lt.u32.totalorder %s651_s18, %s647_s5  ;;  %p655_p9 = scmp.lt.u32.totalorder %s647_s5, %s893_s11 }
 0x1a2   : > { %p649_p12 = pnand %p648_p10, %p952_p11 }
 0x1a3   : > { %p654_p8 = por %p653_p5, %p652_p2 }
 0x1a4   : > { %p650_p1 = pneg %p649_p12 }
 0x1a5   : > { %p656_p0 = por %p655_p9, %p654_p8 }
 0x1a7   : > { %p657_p7 = pnand %p656_p0, %p650_p1 }
 0x1a9   : > { %660 = shalt.err (!%p657_p7)
}
 0x1aa   : > { %530 = dma.vmem_to_hbm [thread:$0]  (%p952_p11), %s888_s23, 128, %s893_s11, %s399_s9  }
 0x1ab PF: > { %s425_s22 = sand.u32 1, %s695_s12   ;;  %p953_p13 = scmp.ne.s32.totalorder %s948_s27, 0 }
 0x1ac   : > { %p954_p3 = scmp.ge.s32.totalorder %s715_s17, 2  ;;  %s426_s28 = scalar_lea.sflag [#allocation4], %s425_s22 }
 0x1ae   : > { %p537_p6 = pnand %p954_p3, %p953_p13 }
 0x1b0   : > { %690 = dma.done.wait (!%p537_p6), %s426_s28, 128  }
 0x1b1   : > { %692 = vsyncadd (!%p537_p6), %s426_s28, 4294967168  ;;  %s19_s17 = sadd.s32 1, %s715_s17   ;;  %s955_s12 = smov %s699_s13 }
 0x1b2   : > { %p16_p4 = scmp.ge.s32.totalorder %s19_s17, 4   ;;  %s956_s13 = smov %s703_s14 }
 0x1b3   : > { %s957_s14 = smov %s796_s26  ;;  %s958_s15 = smov %s711_s16 }
 0x1b4   : > { %s959_s16 = smov %s961_s20  ;;  %18 = sbr.rel (!%p16_p4) target bundleno = 6 (0x6), region = 80 }
 0x1bb   :  { %431 = vsyncpa [#allocation3], 1 }
 0x1bc   :  { %433 = vsyncpa [#allocation3 + $0x1], 1 }
 0x1bd   :  { %434 = vsyncpa [#allocation4], 1 }
 0x1be   :  { %436 = vsyncpa [#allocation4 + $0x1], 1 }

</bundles_post_ra>
